<compile_context>
chip_gen: v7x
topology: tpu7x:2x2x1
jax: 0.10.0
libtpu: 0.0.40
codegen_flags: <defaults>
</compile_context>

<pallas_src>
from typing import NamedTuple, Tuple

import jax
import jax.numpy as jnp
from jax.experimental import pallas as pl
from jax.experimental.pallas import tpu as pltpu


# ------------------------------ helpers -------------------------------------


def _round_up(x, m):
    return ((x + m - 1) // m) * m


def _tpu_cores_per_chip():
    """TensorCores per chip (2 on v7x / v4 megacore, else 1). Best-effort."""
    try:
        info = pltpu.get_tpu_info()
        for name in ("num_cores", "core_count", "tensorcores_per_chip"):
            n = getattr(info, name, None)
            if n:
                return int(n)
    except Exception:
        pass
    try:
        kind = jax.devices()[0].device_kind.lower()
        if ("7x" in kind) or ("v7" in kind) or ("v4" in kind):
            return 2
    except Exception:
        pass
    return 1


def _vmem_capacity_bytes():
    """Per-TensorCore VMEM capacity. Best-effort with conservative fallback."""
    try:
        cap = getattr(pltpu.get_tpu_info(), "vmem_capacity_bytes", None)
        if cap:
            return int(cap)
    except Exception:
        pass
    try:
        kind = jax.devices()[0].device_kind.lower()
        if ("7x" in kind) or ("v7" in kind):
            return 64 << 20
    except Exception:
        pass
    return 128 << 20  # v5e / v6e


def _choose_tm(m, tm_cap, cores_per_chip):
    """Token tile: multiple of 8, <= tm_cap.  A single-tile problem is split in
    two only when the chip has 2 TensorCores (so both get work); on 1-TC chips
    (v5e/v6e) we keep one big, better-utilized tile."""
    m8 = _round_up(max(m, 1), 8)
    tm = min(_round_up(tm_cap, 8), m8)
    if cores_per_chip >= 2 and m8 > 8 and tm >= m8:
        tm = _round_up((m8 + 1) // 2, 8)
    return max(tm, 8)


def _estimate_vmem_bytes(tm, in_dim, out_dim, max_mid, weights_p, biases_p,
                         act_itemsize):
    # Weights/biases are resident with Buffered(1): counted once (not doubled).
    param_bytes = sum(w.size * w.dtype.itemsize + b.size * b.dtype.itemsize
                      for w, b in zip(weights_p, biases_p))
    io_bytes = 2 * tm * (in_dim + out_dim) * act_itemsize  # double-buffered x/out tiles
    work_bytes = 2 * tm * max_mid * 4                      # f32 intermediates
    return param_bytes + io_bytes + work_bytes + (2 << 20)


# --------------------------- parameter preparation --------------------------


class MLPParams(NamedTuple):
    weights: Tuple[jax.Array, ...]   # padded, (K_i, N_i) layout
    biases: Tuple[jax.Array, ...]    # padded, (1, N_i)
    in_dim: int
    out_dim: int


def prepare_mlp_params(weights, biases):
    """Pad parameters once (hoisted out of the per-call hot path).

    weights[i]: (in_dim_i, out_dim_i)  (already transposed vs. torch layout)
    biases[i]:  (out_dim_i,)

    Hidden dims are zero-padded to multiples of 128 so every in-kernel matmul
    runs at full MXU K/N width.  The first layer's K (= input_dim) and the last
    layer's N (= output_dim) stay at their true sizes so the activations need
    no channel padding in HBM.  Zero rows/cols + zero bias keep the math exact
    (padded hidden activations are exactly 0 through ReLU).
    """
    num_layers = len(weights)
    assert len(biases) == num_layers
    dims_in = [w.shape[0] for w in weights]
    dims_out = [w.shape[1] for w in weights]
    hidden_pad = [_round_up(d, 128) for d in dims_out[:-1]]
    k_dims = [dims_in[0]] + hidden_pad
    n_dims = hidden_pad + [dims_out[-1]]

    weights_p, biases_p = [], []
    for w, b, kd, nd in zip(weights, biases, k_dims, n_dims):
        if (kd, nd) != tuple(w.shape):
            w = jnp.pad(w, ((0, kd - w.shape[0]), (0, nd - w.shape[1])))
        if nd != b.shape[0]:
            b = jnp.pad(b, (0, nd - b.shape[0]))
        weights_p.append(w)
        biases_p.append(b.reshape(1, nd))
    return MLPParams(tuple(weights_p), tuple(biases_p), dims_in[0], dims_out[-1])


# ------------------------------ kernel --------------------------------------


def _make_mlp_kernel(num_layers):
    """Fused MLP kernel. refs = (x, w0, b0, w1, b1, ..., out)."""

    def kernel(*refs):
        x_ref = refs[0]
        o_ref = refs[-1]
        params = refs[1:-1]

        h = x_ref[...]
        for i in range(num_layers):
            w = params[2 * i][...]
            b = params[2 * i + 1][...]
            if h.dtype != w.dtype:
                h = h.astype(w.dtype)        # bf16 params -> bf16 MXU operands
            acc = jnp.dot(h, w, preferred_element_type=jnp.float32)  # f32 acc
            acc = acc + b.astype(jnp.float32)
            if i < num_layers - 1:
                h = jnp.maximum(acc, 0.0)    # ReLU on the VPU, kept in f32
            else:
                h = acc
        o_ref[...] = h.astype(o_ref.dtype)

    return kernel


def _resident_spec(shape, use_buffered):
    """Constant-index (resident) block: no benefit from 2-deep pipelining."""
    index_map = lambda i: (0, 0)
    if use_buffered and hasattr(pl, "Buffered"):
        try:
            return pl.BlockSpec(shape, index_map, pipeline_mode=pl.Buffered(1))
        except TypeError:  # older jax without pipeline_mode kwarg
            pass
    return pl.BlockSpec(shape, index_map)


# ------------------------------ wrapper -------------------------------------


def mlp_pallas(x, params: MLPParams, *, tm=1024):
    """Apply the MLP to x of shape [..., input_dim]."""
    weights_p, biases_p = params.weights, params.biases
    in_dim, out_dim = params.in_dim, params.out_dim
    num_layers = len(weights_p)
    lead_shape = x.shape[:-1]
    assert x.shape[-1] == in_dim

    x2d = x.reshape(-1, in_dim)
    m = x2d.shape[0]

    cores = _tpu_cores_per_chip()
    vmem_cap = int(0.8 * _vmem_capacity_bytes())  # leave compiler headroom
    max_mid = max([in_dim, out_dim] + [w.shape[1] for w in weights_p])

    tm_eff = _choose_tm(m, tm, cores)
    est = _estimate_vmem_bytes(tm_eff, in_dim, out_dim, max_mid,
                               weights_p, biases_p, x.dtype.itemsize)
    while est > vmem_cap and tm_eff > 256:
        tm_eff = max(256, _round_up(tm_eff // 2, 8))
        est = _estimate_vmem_bytes(tm_eff, in_dim, out_dim, max_mid,
                                   weights_p, biases_p, x.dtype.itemsize)
    # TODO(synk): K-tiled fallback (grid axis over the hidden dim with a VMEM
    # accumulator + pl.when init/finalize) for hidden dims too large to keep
    # all layer weights resident in v7x's 64 MiB per-core VMEM.
    vmem_limit = int(min(max(est, 32 << 20), vmem_cap))

    kernel = _make_mlp_kernel(num_layers)
    grid = (pl.cdiv(m, tm_eff),)  # cdiv grid: edge block is masked, no M pad

    params_interleaved = []
    for wp, bp in zip(weights_p, biases_p):
        params_interleaved.extend([wp, bp])

    def run(use_buffered):
        in_specs = [pl.BlockSpec((tm_eff, in_dim), lambda i: (i, 0))]
        for wp, bp in zip(weights_p, biases_p):
            in_specs.append(_resident_spec(wp.shape, use_buffered))
            in_specs.append(_resident_spec(bp.shape, use_buffered))
        # Output written at its true width: lane-dense when out_dim % 128 == 0
        # (mask2former: 256); for tiny out_dim a masked store beats an 8x
        # padded HBM write plus a post-slice re-read.
        out_spec = pl.BlockSpec((tm_eff, out_dim), lambda i: (i, 0))
        return pl.pallas_call(
            kernel,
            out_shape=jax.ShapeDtypeStruct((m, out_dim), x.dtype),
            grid_spec=pltpu.PrefetchScalarGridSpec(
                num_scalar_prefetch=0,
                grid=grid,
                in_specs=in_specs,
                out_specs=out_spec,
            ),
            compiler_params=pltpu.CompilerParams(
                dimension_semantics=("parallel",),
                vmem_limit_bytes=vmem_limit,
            ),
        )(x2d, *params_interleaved)

    try:
        out2d = run(use_buffered=True)
    except Exception:
        out2d = run(use_buffered=False)  # jax without Buffered(1) support

    return out2d.reshape(*lead_shape, out_dim)


# ------------------------------ init / reference ----------------------------


def init_mlp_params(key, input_dim, hidden_dim, output_dim, num_layers,
                    dtype=jnp.float32):
    """Deterministic nn.Linear-style init. Weights in (in_dim, out_dim) layout."""
    h = [hidden_dim] * (num_layers - 1)
    dims_in = [input_dim] + h
    dims_out = h + [output_dim]
    weights, biases = [], []
    for n, k in zip(dims_in, dims_out):
        key, kw, kb = jax.random.split(key, 3)
        bound = 1.0 / jnp.sqrt(jnp.asarray(n, dtype=jnp.float32))
        w = jax.random.uniform(kw, (n, k), dtype=dtype, minval=-bound, maxval=bound)
        b = jax.random.uniform(kb, (k,), dtype=dtype, minval=-bound, maxval=bound)
        weights.append(w)
        biases.append(b)
    return weights, biases


def mlp_reference(x, weights, biases):
    """Plain-JAX reference matching the torch forward semantics."""
    num_layers = len(weights)
    h = x
    for i, (w, b) in enumerate(zip(weights, biases)):
        h = h @ w + b
        if i < num_layers - 1:
            h = jnp.maximum(h, 0.0)
    return h


if __name__ == "__main__":
    key = jax.random.PRNGKey(0)

    # Small shapes consistent with the module: (batch=2, seq=8, input_dim=16),
    # hidden=32, output=16, 3 layers (typical mask2former MLP depth).
    batch, seq, input_dim, hidden_dim, output_dim, num_layers = 2, 8, 16, 32, 16, 3

    key, kx, kp = jax.random.split(key, 3)
    x = jax.random.normal(kx, (batch, seq, input_dim), dtype=jnp.float32)
    weights, biases = init_mlp_params(kp, input_dim, hidden_dim, output_dim, num_layers)

    # Pad parameters once; reuse across calls (no per-call pad in the hot path).
    prepared = prepare_mlp_params(weights, biases)

    out = jax.block_until_ready(mlp_pallas(x, prepared))
    ref = mlp_reference(x, weights, biases)
    assert out.shape == (batch, seq, output_dim)
    assert jnp.allclose(out, ref, atol=1e-5, rtol=1e-5), "mismatch vs reference"

    # Non-tile-divisible token count (cdiv / masked edge-block path).
    key, kx2 = jax.random.split(key)
    x2 = jax.random.normal(kx2, (3, 7, input_dim), dtype=jnp.float32)
    out2 = jax.block_until_ready(mlp_pallas(x2, prepared))
    ref2 = mlp_reference(x2, weights, biases)
    assert out2.shape == (3, 7, output_dim)
    assert jnp.allclose(out2, ref2, atol=1e-5, rtol=1e-5), "mismatch vs reference (ragged M)"

    # bf16-parameter MXU path (mixed precision; loose tolerance vs f32 reference).
    weights_bf = [w.astype(jnp.bfloat16) for w in weights]
    biases_bf = [b.astype(jnp.bfloat16) for b in biases]
    prepared_bf = prepare_mlp_params(weights_bf, biases_bf)
    out_bf = jax.block_until_ready(mlp_pallas(x, prepared_bf))
    assert out_bf.shape == (batch, seq, output_dim)
    assert jnp.allclose(out_bf.astype(jnp.float32), ref, atol=0.1, rtol=0.1), \
        "mismatch vs reference (bf16 path)"

    print("KERNEL_OK")
</pallas_src>

<mosaic_0001>
module attributes {stable_mosaic.version = 11 : i64} {
  func.func @kernel(%arg0: i32, %arg1: memref<16x16xf32, #tpu.memory_space<vmem>>, %arg2: memref<16x128xf32, #tpu.memory_space<vmem>>, %arg3: memref<1x128xf32, #tpu.memory_space<vmem>>, %arg4: memref<128x128xf32, #tpu.memory_space<vmem>>, %arg5: memref<1x128xf32, #tpu.memory_space<vmem>>, %arg6: memref<128x16xf32, #tpu.memory_space<vmem>>, %arg7: memref<1x16xf32, #tpu.memory_space<vmem>>, %arg8: memref<16x16xf32, #tpu.memory_space<vmem>>) attributes {dimension_semantics = [#tpu.dimension_semantics<parallel>], iteration_bounds = array<i64: 1>, scalar_prefetch = 0 : i64, scratch_operands = 0 : i64, tpu.core_type = #tpu.core_type<tc>, window_params = [{transform_indices = @transform_0, window_bounds = array<i64: 16, 16>}, {pipeline_mode = #tpu.pipeline_mode<synchronous>, transform_indices = @transform_1, window_bounds = array<i64: 16, 128>}, {pipeline_mode = #tpu.pipeline_mode<synchronous>, transform_indices = @transform_2, window_bounds = array<i64: 1, 128>}, {pipeline_mode = #tpu.pipeline_mode<synchronous>, transform_indices = @transform_3, window_bounds = array<i64: 128, 128>}, {pipeline_mode = #tpu.pipeline_mode<synchronous>, transform_indices = @transform_4, window_bounds = array<i64: 1, 128>}, {pipeline_mode = #tpu.pipeline_mode<synchronous>, transform_indices = @transform_5, window_bounds = array<i64: 128, 16>}, {pipeline_mode = #tpu.pipeline_mode<synchronous>, transform_indices = @transform_6, window_bounds = array<i64: 1, 16>}, {transform_indices = @transform_7, window_bounds = array<i64: 16, 16>}]} {
    %c0 = arith.constant 0 : index
    %c0_0 = arith.constant 0 : index
    %0 = vector.load %arg1[%c0, %c0_0] : memref<16x16xf32, #tpu.memory_space<vmem>>, vector<16x16xf32>
    %c0_1 = arith.constant 0 : index
    %c0_2 = arith.constant 0 : index
    %1 = vector.load %arg2[%c0_1, %c0_2] : memref<16x128xf32, #tpu.memory_space<vmem>>, vector<16x128xf32>
    %c0_3 = arith.constant 0 : index
    %c0_4 = arith.constant 0 : index
    %2 = vector.load %arg3[%c0_3, %c0_4] : memref<1x128xf32, #tpu.memory_space<vmem>>, vector<1x128xf32>
    %cst = arith.constant dense<0.000000e+00> : vector<16x128xf32>
    %3 = tpu.matmul %0, %1, %cst {dimension_numbers = #tpu.dot_dimension_numbers<[1], [0], [0], [1], [0, 0, 1, 1], [], []>} : vector<16x16xf32>, vector<16x128xf32>, vector<16x128xf32> -> vector<16x128xf32>
    %4 = vector.broadcast %2 : vector<1x128xf32> to vector<16x128xf32>
    %5 = arith.addf %3, %4 : vector<16x128xf32>
    %cst_5 = arith.constant 0.000000e+00 : f32
    %6 = vector.broadcast %cst_5 : f32 to vector<16x128xf32>
    %7 = arith.maximumf %5, %6 : vector<16x128xf32>
    %c0_6 = arith.constant 0 : index
    %c0_7 = arith.constant 0 : index
    %8 = vector.load %arg4[%c0_6, %c0_7] : memref<128x128xf32, #tpu.memory_space<vmem>>, vector<128x128xf32>
    %c0_8 = arith.constant 0 : index
    %c0_9 = arith.constant 0 : index
    %9 = vector.load %arg5[%c0_8, %c0_9] : memref<1x128xf32, #tpu.memory_space<vmem>>, vector<1x128xf32>
    %cst_10 = arith.constant dense<0.000000e+00> : vector<16x128xf32>
    %10 = tpu.matmul %7, %8, %cst_10 {dimension_numbers = #tpu.dot_dimension_numbers<[1], [0], [0], [1], [0, 0, 1, 1], [], []>} : vector<16x128xf32>, vector<128x128xf32>, vector<16x128xf32> -> vector<16x128xf32>
    %11 = vector.broadcast %9 : vector<1x128xf32> to vector<16x128xf32>
    %12 = arith.addf %10, %11 : vector<16x128xf32>
    %cst_11 = arith.constant 0.000000e+00 : f32
    %13 = vector.broadcast %cst_11 : f32 to vector<16x128xf32>
    %14 = arith.maximumf %12, %13 : vector<16x128xf32>
    %c0_12 = arith.constant 0 : index
    %c0_13 = arith.constant 0 : index
    %15 = vector.load %arg6[%c0_12, %c0_13] : memref<128x16xf32, #tpu.memory_space<vmem>>, vector<128x16xf32>
    %c0_14 = arith.constant 0 : index
    %c0_15 = arith.constant 0 : index
    %16 = vector.load %arg7[%c0_14, %c0_15] : memref<1x16xf32, #tpu.memory_space<vmem>>, vector<1x16xf32>
    %cst_16 = arith.constant dense<0.000000e+00> : vector<16x16xf32>
    %17 = tpu.matmul %14, %15, %cst_16 {dimension_numbers = #tpu.dot_dimension_numbers<[1], [0], [0], [1], [0, 0, 1, 1], [], []>} : vector<16x128xf32>, vector<128x16xf32>, vector<16x16xf32> -> vector<16x16xf32>
    %18 = vector.broadcast %16 : vector<1x16xf32> to vector<16x16xf32>
    %19 = arith.addf %17, %18 : vector<16x16xf32>
    %c0_17 = arith.constant 0 : index
    %c0_18 = arith.constant 0 : index
    %20 = vector.load %arg8[%c0_17, %c0_18] : memref<16x16xf32, #tpu.memory_space<vmem>>, vector<16x16xf32>
    tpu.vector_store %arg8[%c0_17, %c0_18], %19 {strides = array<i32>} : memref<16x16xf32, #tpu.memory_space<vmem>>, vector<16x16xf32>,
    return
  }
  func.func @transform_0(%arg0: i32) -> (i32, i32) {
    %c0_i32 = arith.constant 0 : i32
    %c0_i32_0 = arith.constant 0 : i32
    return %arg0, %c0_i32 : i32, i32
  }
  func.func @transform_1(%arg0: i32) -> (i32, i32) {
    %c0_i32 = arith.constant 0 : i32
    %c0_i32_0 = arith.constant 0 : i32
    %c0_i32_1 = arith.constant 0 : i32
    return %c0_i32, %c0_i32_0 : i32, i32
  }
  func.func @transform_2(%arg0: i32) -> (i32, i32) {
    %c0_i32 = arith.constant 0 : i32
    %c0_i32_0 = arith.constant 0 : i32
    %c0_i32_1 = arith.constant 0 : i32
    return %c0_i32, %c0_i32_0 : i32, i32
  }
  func.func @transform_3(%arg0: i32) -> (i32, i32) {
    %c0_i32 = arith.constant 0 : i32
    %c0_i32_0 = arith.constant 0 : i32
    %c0_i32_1 = arith.constant 0 : i32
    return %c0_i32, %c0_i32_0 : i32, i32
  }
  func.func @transform_4(%arg0: i32) -> (i32, i32) {
    %c0_i32 = arith.constant 0 : i32
    %c0_i32_0 = arith.constant 0 : i32
    %c0_i32_1 = arith.constant 0 : i32
    return %c0_i32, %c0_i32_0 : i32, i32
  }
  func.func @transform_5(%arg0: i32) -> (i32, i32) {
    %c0_i32 = arith.constant 0 : i32
    %c0_i32_0 = arith.constant 0 : i32
    %c0_i32_1 = arith.constant 0 : i32
    return %c0_i32, %c0_i32_0 : i32, i32
  }
  func.func @transform_6(%arg0: i32) -> (i32, i32) {
    %c0_i32 = arith.constant 0 : i32
    %c0_i32_0 = arith.constant 0 : i32
    %c0_i32_1 = arith.constant 0 : i32
    return %c0_i32, %c0_i32_0 : i32, i32
  }
  func.func @transform_7(%arg0: i32) -> (i32, i32) {
    %c0_i32 = arith.constant 0 : i32
    %c0_i32_0 = arith.constant 0 : i32
    return %arg0, %c0_i32 : i32, i32
  }
}

module attributes {stable_mosaic.version = 11 : i64} {
  func.func @kernel(%arg0: i32, %arg1: memref<16x16xf32, #tpu.memory_space<vmem>>, %arg2: memref<16x128xf32, #tpu.memory_space<vmem>>, %arg3: memref<1x128xf32, #tpu.memory_space<vmem>>, %arg4: memref<128x128xf32, #tpu.memory_space<vmem>>, %arg5: memref<1x128xf32, #tpu.memory_space<vmem>>, %arg6: memref<128x16xf32, #tpu.memory_space<vmem>>, %arg7: memref<1x16xf32, #tpu.memory_space<vmem>>, %arg8: memref<16x16xf32, #tpu.memory_space<vmem>>) attributes {dimension_semantics = [#tpu.dimension_semantics<parallel>], iteration_bounds = array<i64: 1>, scalar_prefetch = 0 : i64, scratch_operands = 0 : i64, tpu.core_type = #tpu.core_type<tc>, window_params = [{transform_indices = @transform_0, window_bounds = array<i64: 16, 16>}, {pipeline_mode = #tpu.pipeline_mode<synchronous>, transform_indices = @transform_1, window_bounds = array<i64: 16, 128>}, {pipeline_mode = #tpu.pipeline_mode<synchronous>, transform_indices = @transform_2, window_bounds = array<i64: 1, 128>}, {pipeline_mode = #tpu.pipeline_mode<synchronous>, transform_indices = @transform_3, window_bounds = array<i64: 128, 128>}, {pipeline_mode = #tpu.pipeline_mode<synchronous>, transform_indices = @transform_4, window_bounds = array<i64: 1, 128>}, {pipeline_mode = #tpu.pipeline_mode<synchronous>, transform_indices = @transform_5, window_bounds = array<i64: 128, 16>}, {pipeline_mode = #tpu.pipeline_mode<synchronous>, transform_indices = @transform_6, window_bounds = array<i64: 1, 16>}, {transform_indices = @transform_7, window_bounds = array<i64: 16, 16>}]} {
    %c0 = arith.constant 0 : index
    %c0_0 = arith.constant 0 : index
    %0 = vector.load %arg1[%c0, %c0_0] : memref<16x16xf32, #tpu.memory_space<vmem>>, vector<16x16xf32>
    %c0_1 = arith.constant 0 : index
    %c0_2 = arith.constant 0 : index
    %1 = vector.load %arg2[%c0_1, %c0_2] : memref<16x128xf32, #tpu.memory_space<vmem>>, vector<16x128xf32>
    %c0_3 = arith.constant 0 : index
    %c0_4 = arith.constant 0 : index
    %2 = vector.load %arg3[%c0_3, %c0_4] : memref<1x128xf32, #tpu.memory_space<vmem>>, vector<1x128xf32>
    %cst = arith.constant dense<0.000000e+00> : vector<16x128xf32>
    %3 = tpu.matmul %0, %1, %cst {dimension_numbers = #tpu.dot_dimension_numbers<[1], [0], [0], [1], [0, 0, 1, 1], [], []>} : vector<16x16xf32>, vector<16x128xf32>, vector<16x128xf32> -> vector<16x128xf32>
    %4 = vector.broadcast %2 : vector<1x128xf32> to vector<16x128xf32>
    %5 = arith.addf %3, %4 : vector<16x128xf32>
    %cst_5 = arith.constant 0.000000e+00 : f32
    %6 = vector.broadcast %cst_5 : f32 to vector<16x128xf32>
    %7 = arith.maximumf %5, %6 : vector<16x128xf32>
    %c0_6 = arith.constant 0 : index
    %c0_7 = arith.constant 0 : index
    %8 = vector.load %arg4[%c0_6, %c0_7] : memref<128x128xf32, #tpu.memory_space<vmem>>, vector<128x128xf32>
    %c0_8 = arith.constant 0 : index
    %c0_9 = arith.constant 0 : index
    %9 = vector.load %arg5[%c0_8, %c0_9] : memref<1x128xf32, #tpu.memory_space<vmem>>, vector<1x128xf32>
    %cst_10 = arith.constant dense<0.000000e+00> : vector<16x128xf32>
    %10 = tpu.matmul %7, %8, %cst_10 {dimension_numbers = #tpu.dot_dimension_numbers<[1], [0], [0], [1], [0, 0, 1, 1], [], []>} : vector<16x128xf32>, vector<128x128xf32>, vector<16x128xf32> -> vector<16x128xf32>
    %11 = vector.broadcast %9 : vector<1x128xf32> to vector<16x128xf32>
    %12 = arith.addf %10, %11 : vector<16x128xf32>
    %cst_11 = arith.constant 0.000000e+00 : f32
    %13 = vector.broadcast %cst_11 : f32 to vector<16x128xf32>
    %14 = arith.maximumf %12, %13 : vector<16x128xf32>
    %c0_12 = arith.constant 0 : index
    %c0_13 = arith.constant 0 : index
    %15 = vector.load %arg6[%c0_12, %c0_13] : memref<128x16xf32, #tpu.memory_space<vmem>>, vector<128x16xf32>
    %c0_14 = arith.constant 0 : index
    %c0_15 = arith.constant 0 : index
    %16 = vector.load %arg7[%c0_14, %c0_15] : memref<1x16xf32, #tpu.memory_space<vmem>>, vector<1x16xf32>
    %cst_16 = arith.constant dense<0.000000e+00> : vector<16x16xf32>
    %17 = tpu.matmul %14, %15, %cst_16 {dimension_numbers = #tpu.dot_dimension_numbers<[1], [0], [0], [1], [0, 0, 1, 1], [], []>} : vector<16x128xf32>, vector<128x16xf32>, vector<16x16xf32> -> vector<16x16xf32>
    %18 = vector.broadcast %16 : vector<1x16xf32> to vector<16x16xf32>
    %19 = arith.addf %17, %18 : vector<16x16xf32>
    %c0_17 = arith.constant 0 : index
    %c0_18 = arith.constant 0 : index
    %20 = vector.load %arg8[%c0_17, %c0_18] : memref<16x16xf32, #tpu.memory_space<vmem>>, vector<16x16xf32>
    tpu.vector_store %arg8[%c0_17, %c0_18], %19 {strides = array<i32>} : memref<16x16xf32, #tpu.memory_space<vmem>>, vector<16x16xf32>,
    return
  }
  func.func @transform_0(%arg0: i32) -> (i32, i32) {
    %c0_i32 = arith.constant 0 : i32
    %c0_i32_0 = arith.constant 0 : i32
    return %arg0, %c0_i32 : i32, i32
  }
  func.func @transform_1(%arg0: i32) -> (i32, i32) {
    %c0_i32 = arith.constant 0 : i32
    %c0_i32_0 = arith.constant 0 : i32
    %c0_i32_1 = arith.constant 0 : i32
    return %c0_i32, %c0_i32_0 : i32, i32
  }
  func.func @transform_2(%arg0: i32) -> (i32, i32) {
    %c0_i32 = arith.constant 0 : i32
    %c0_i32_0 = arith.constant 0 : i32
    %c0_i32_1 = arith.constant 0 : i32
    return %c0_i32, %c0_i32_0 : i32, i32
  }
  func.func @transform_3(%arg0: i32) -> (i32, i32) {
    %c0_i32 = arith.constant 0 : i32
    %c0_i32_0 = arith.constant 0 : i32
    %c0_i32_1 = arith.constant 0 : i32
    return %c0_i32, %c0_i32_0 : i32, i32
  }
  func.func @transform_4(%arg0: i32) -> (i32, i32) {
    %c0_i32 = arith.constant 0 : i32
    %c0_i32_0 = arith.constant 0 : i32
    %c0_i32_1 = arith.constant 0 : i32
    return %c0_i32, %c0_i32_0 : i32, i32
  }
  func.func @transform_5(%arg0: i32) -> (i32, i32) {
    %c0_i32 = arith.constant 0 : i32
    %c0_i32_0 = arith.constant 0 : i32
    %c0_i32_1 = arith.constant 0 : i32
    return %c0_i32, %c0_i32_0 : i32, i32
  }
  func.func @transform_6(%arg0: i32) -> (i32, i32) {
    %c0_i32 = arith.constant 0 : i32
    %c0_i32_0 = arith.constant 0 : i32
    %c0_i32_1 = arith.constant 0 : i32
    return %c0_i32, %c0_i32_0 : i32, i32
  }
  func.func @transform_7(%arg0: i32) -> (i32, i32) {
    %c0_i32 = arith.constant 0 : i32
    %c0_i32_0 = arith.constant 0 : i32
    return %arg0, %c0_i32 : i32, i32
  }
}

</mosaic_0001>

<bundles_post_ra>
// kernel: tpu_custom_call.1
= control target key start
LH: loop header
LB: loop body
LE: loop exit
PB: predicated region body
PF: predicated region fallthrough
CT: control target
= control target key end

     0   :  { %12 = vsyncpa [#allocation3], 0  ;;  %s784_s0 = inlined_call_operand.vmem [shape: f32[16,16], index: 0, kind: input, shape index: {}]   ;;  %s785_s1 = inlined_call_operand.hbm [shape: f32[16,128], index: 1, kind: input, shape index: {}]   ;;  %s786_s2 = inlined_call_operand.vmem [shape: f32[1,128], index: 2, kind: input, shape index: {}]   ;;  %s787_s3 = inlined_call_operand.vmem [shape: f32[128,128], index: 3, kind: input, shape index: {}]   ;;  %s788_s4 = inlined_call_operand.vmem [shape: f32[1,128], index: 4, kind: input, shape index: {}]   ;;  %s789_s5 = inlined_call_operand.vmem [shape: f32[128,16], index: 5, kind: input, shape index: {}]   ;;  %s790_s6 = inlined_call_operand.vmem [shape: f32[1,16], index: 6, kind: input, shape index: {}]   ;;  %s791_s7 = inlined_call_operand.hbm [shape: f32[16,16], index: 7, kind: output, shape index: {}]  }
   0x1   :  { %13 = vsyncpa [#allocation4], 0  ;;  %s595_s24 = smov [#allocation2]   ;;  %s547_s28 = scalar_lea.hbm %s785_s1, 256 }
   0x2   :  { %s21_s25 = sshll.u32 %s595_s24, 4  ;;  %p548_p0 = scmp.ne.s32.totalorder %s785_s1, %s547_s28  ;;  %s22_s25 = int_to_ptr.vmem [resolvable:$true] %s21_s25 }
   0x3   :  { %p551_p1 = scmp.lt.u32.totalorder %s547_s28, %s785_s1 }
   0x5   :  { %p553_p2 = pnand %p551_p1, %p548_p0 }
   0x7   :  { %556 = shalt.err (!%p553_p2)
}
   0x8   :  { %s557_s10 = scalar_lea.vmem %s22_s25, 256  ;;  %p562_p4 = scmp.lt.s32.totalorder %s22_s25, %s22_s25 }
   0x9   :  { %p558_p3 = scmp.ne.s32.totalorder %s22_s25, %s557_s10  ;;  %p563_p5 = scmp.lt.s32.totalorder %s557_s10, %s557_s10 }
   0xb   :  { %p564_p6 = por %p563_p5, %p562_p4 }
   0xd   :  { %p565_p7 = pnand %p564_p6, %p558_p3 }
   0xf   :  { %568 = shalt.err (!%p565_p7)
}
  0x10   :  { %s596_s11 = smov 128   ;;  %s597_s12 = smov 8  }
  0x11   :  { %27 = dma.hbm_to_vmem [thread:$0]  %s785_s1, 256, %s22_s25, [#allocation3], %s596_s11, %s596_s11, %s597_s12  }
  0x12   :  { %591 = dma.done.wait [#allocation3], 256  }
  0x13   :  { %592 = vsyncadd [#allocation3], 4294967040  ;;  %vm52_vm0 = vcmask 130048   ;;  %v43_v0 = vld [vmem:[#allocation2] sm:$0xff]  ;;  %v44_v1 = vld [vmem:[#allocation2 + $0x8] sm:$0xff] }
  0x14   :  { %v41_v2 = vld [vmem:[%s784_s0] sm:$0xff]  ;;  %v475_v3 = vpack.c.bf16 %v44_v1, %v43_v0  ;;  %v137_v5 = vld [vmem:[%s787_s3 + $0x8] sm:$0xff]  ;;  %v138_v7 = vld [vmem:[%s787_s3 + $0x10] sm:$0xff] }
  0x15   :  { %402 = vmatprep.mubr.msk.f32.mxu0 %vm52_vm0, %v41_v2  ;;  %v136_v4 = vld [vmem:[%s787_s3] sm:$0xff]  ;;  %v139_v8 = vld [vmem:[%s787_s3 + $0x18] sm:$0xff]  ;;  %v141_v11 = vld [vmem:[%s787_s3 + $0x28] sm:$0xff] }
  0x16   :  { %v479_v6 = vpack.c.bf16 %v137_v5, %v136_v4  ;;  %476 = vmatprep.subr.bf16.mxu0 %v475_v3  ;;  %v483_v9 = vpack.c.bf16 %v139_v8, %v138_v7  ;;  %v140_v10 = vld [vmem:[%s787_s3 + $0x20] sm:$0xff]  ;;  %v42_v12 = vld [vmem:[%s784_s0 + $0x8] sm:$0xff]  ;;  %v142_v14 = vld [vmem:[%s787_s3 + $0x30] sm:$0xff] }
  0x17   :  { %478 = vmatpush3.bf16.msra.mxu0 %v475_v3  ;;  %v487_v13 = vpack.c.bf16 %v141_v11, %v140_v10  ;;  %v143_v15 = vld [vmem:[%s787_s3 + $0x38] sm:$0xff]  ;;  %v144_v17 = vld [vmem:[%s787_s3 + $0x40] sm:$0xff]  ;;  %v145_v18 = vld [vmem:[%s787_s3 + $0x48] sm:$0xff] }
  0x18   :  { %480 = vmatprep.subr.bf16.mxu1 %v479_v6  ;;  %v491_v16 = vpack.c.bf16 %v143_v15, %v142_v14  ;;  %v495_v19 = vpack.c.bf16 %v145_v18, %v144_v17  ;;  %v146_v20 = vld [vmem:[%s787_s3 + $0x50] sm:$0xff]  ;;  %v147_v21 = vld [vmem:[%s787_s3 + $0x58] sm:$0xff]  ;;  %v148_v23 = vld [vmem:[%s787_s3 + $0x60] sm:$0xff] }
  0x19   :  { %482 = vmatpush3.bf16.msra.mxu1 %v479_v6  ;;  %v499_v22 = vpack.c.bf16 %v147_v21, %v146_v20  ;;  %v149_v24 = vld [vmem:[%s787_s3 + $0x68] sm:$0xff]  ;;  %v150_v26 = vld [vmem:[%s787_s3 + $0x70] sm:$0xff]  ;;  %v151_v27 = vld [vmem:[%s787_s3 + $0x78] sm:$0xff] }
  0x1a   :  { %484 = vmatprep.subr.bf16.mxu1 %v483_v9  ;;  %403 = vmatmul.mubr.msk.f32.vlgmr.msra.gmra.mrb[0].mxu0 %vm52_vm0, %v42_v12  ;;  %v503_v25 = vpack.c.bf16 %v149_v24, %v148_v23  ;;  %v507_v28 = vpack.c.bf16 %v151_v27, %v150_v26  ;;  %v236_v29 = vld [vmem:[%s789_s5] sm:$0xff]  ;;  %v237_v30 = vld [vmem:[%s789_s5 + $0x8] sm:$0xff]  ;;  %v238_v31 = vld [vmem:[%s789_s5 + $0x10] sm:$0xff] }
  0x1b   :  { %v511_v32 = vpack.c.bf16 %v237_v30, %v236_v29  ;;  %v239_v33 = vld [vmem:[%s789_s5 + $0x18] sm:$0xff]  ;;  %v240_v35 = vld [vmem:[%s789_s5 + $0x20] sm:$0xff]  ;;  %v241_v36 = vld [vmem:[%s789_s5 + $0x28] sm:$0xff] }
  0x1c   :  { %v515_v34 = vpack.c.bf16 %v239_v33, %v238_v31  ;;  %v519_v37 = vpack.c.bf16 %v241_v36, %v240_v35  ;;  %v242_v38 = vld [vmem:[%s789_s5 + $0x30] sm:$0xff]  ;;  %v243_v39 = vld [vmem:[%s789_s5 + $0x38] sm:$0xff]  ;;  %v244_v41 = vld [vmem:[%s789_s5 + $0x40] sm:$0xff] }
  0x1d   :  { %486 = vmatpush3.bf16.msra.mxu1 %v483_v9  ;;  %512 = vmatprep.subr.bf16.mxu0 %v511_v32  ;;  %v523_v40 = vpack.c.bf16 %v243_v39, %v242_v38  ;;  %v245_v42 = vld [vmem:[%s789_s5 + $0x48] sm:$0xff]  ;;  %v246_v44 = vld [vmem:[%s789_s5 + $0x50] sm:$0xff]  ;;  %v247_v45 = vld [vmem:[%s789_s5 + $0x58] sm:$0xff] }
  0x1e   :  { %488 = vmatprep.subr.bf16.mxu1 %v487_v13  ;;  %514 = vmatpush3.bf16.msra.mxu0 %v511_v32  ;;  %v527_v43 = vpack.c.bf16 %v245_v42, %v244_v41  ;;  %v531_v46 = vpack.c.bf16 %v247_v45, %v246_v44  ;;  %v248_v47 = vld [vmem:[%s789_s5 + $0x60] sm:$0xff]  ;;  %v249_v48 = vld [vmem:[%s789_s5 + $0x68] sm:$0xff]  ;;  %v250_v57 = vld [vmem:[%s789_s5 + $0x70] sm:$0xff] }
  0x1f   :  { %516 = vmatprep.subr.bf16.mxu0 %v515_v34  ;;  %v535_v49 = vpack.c.bf16 %v249_v48, %v248_v47  ;;  %v353_v50 = vld [vmem:[%s786_s2] ss:$0 sm:$0xff]  ;;  %v251_v58 = vld [vmem:[%s789_s5 + $0x78] sm:$0xff]  ;;  %s598_s5 = smov [#allocation5]  }
  0x20   :  { %v539_v59 = vpack.c.bf16 %v251_v58, %v250_v57  ;;  %v356_v60 = vld [vmem:[%s788_s4] ss:$0 sm:$0xff]  ;;  %s341_s17 = sshll.u32 %s598_s5, 4  ;;  %s342_s17 = int_to_ptr.vmem [resolvable:$true] %s341_s17 }
  0x21   :  { %490 = vmatpush3.bf16.msra.mxu1 %v487_v13  ;;  %v357_v3 = vld [vmem:[%s790_s6] ss:$0 sm:$0xff]  ;;  %s569_s4 = scalar_lea.vmem %s342_s17, 256  ;;  %p574_p9 = scmp.lt.s32.totalorder %s342_s17, %s342_s17 }
  0x22   :  { %492 = vmatprep.subr.bf16.mxu1 %v491_v16  ;;  %518 = vmatpush3.bf16.msra.mxu0 %v515_v34  ;;  %p570_p8 = scmp.ne.s32.totalorder %s342_s17, %s569_s4  ;;  %p575_p10 = scmp.lt.s32.totalorder %s569_s4, %s569_s4 }
  0x23   :  { %520 = vmatprep.subr.bf16.mxu0 %v519_v37 }
  0x24   :  { %p576_p11 = por %p575_p10, %p574_p9 }
  0x25   :  { %494 = vmatpush3.bf16.msra.mxu1 %v491_v16 }
  0x26   :  { %496 = vmatprep.subr.bf16.mxu1 %v495_v19  ;;  %522 = vmatpush3.bf16.msra.mxu0 %v519_v37  ;;  %p577_p12 = pnand %p576_p11, %p570_p8 }
  0x27   :  { %524 = vmatprep.subr.bf16.mxu0 %v523_v40 }
  0x29   :  { %498 = vmatpush3.bf16.msra.mxu1 %v495_v19 }
  0x2a   :  { %500 = vmatprep.subr.bf16.mxu1 %v499_v22  ;;  %526 = vmatpush3.bf16.msra.mxu0 %v523_v40 }
  0x2b   :  { %528 = vmatprep.subr.bf16.mxu0 %v527_v43 }
  0x2d   :  { %502 = vmatpush3.bf16.msra.mxu1 %v499_v22 }
  0x2e   :  { %504 = vmatprep.subr.bf16.mxu1 %v503_v25  ;;  %530 = vmatpush3.bf16.msra.mxu0 %v527_v43 }
  0x2f   :  { %532 = vmatprep.subr.bf16.mxu0 %v531_v46 }
  0x31   :  { %506 = vmatpush3.bf16.msra.mxu1 %v503_v25 }
  0x32   :  { %508 = vmatprep.subr.bf16.mxu1 %v507_v28  ;;  %534 = vmatpush3.bf16.msra.mxu0 %v531_v46 }
  0x33   :  { %536 = vmatprep.subr.bf16.mxu0 %v535_v49 }
  0x35   :  { %510 = vmatpush3.bf16.msra.mxu1 %v507_v28 }
  0x36   :  { %538 = vmatpush3.bf16.msra.mxu0 %v535_v49 }
  0x37   :  { %540 = vmatprep.subr.bf16.mxu0 %v539_v59 }
  0x3a   :  { %542 = vmatpush3.bf16.msra.mxu0 %v539_v59 }
  0xed   :  { %v404_v51 = vpop.f32.mrb[0].mxu0 }
  0xee   :  { %v131_v52 = vadd.f32 %v404_v51, %v353_v50  ;;  %v125_v53 = vpop.f32.mrb[1].mxu0 }
  0xef   :  { %v126_v54 = vadd.f32 %v353_v50, %v125_v53 }
  0xf0   :  { %v135_v56 = vmax.f32 %v131_v52, 0.0 }
  0xf1   :  { %v134_v55 = vmax.f32 %v126_v54, 0.0 }
  0xf3   :  { %437 = vmatprep.mubr.f32.mxu1 %v134_v55 }
  0xf4   :  { %438 = vmatmul.mubr.f32.vlgmr.msra.gmra.mrb[0].mxu1 %v135_v56 }
 0x1c7   :  { %v439_v61 = vpop.f32.mrb[0].mxu1 }
 0x1c8   :  { %v231_v62 = vadd.f32 %v439_v61, %v356_v60  ;;  %v225_v63 = vpop.f32.mrb[1].mxu1 }
 0x1c9   :  { %v226_v0 = vadd.f32 %v356_v60, %v225_v63 }
 0x1ca   :  { %v235_v2 = vmax.f32 %v231_v62, 0.0 }
 0x1cb   :  { %v234_v1 = vmax.f32 %v226_v0, 0.0 }
 0x1cd   :  { %472 = vmatprep.mubr.f32.mxu0 %v234_v1 }
 0x1ce   :  { %473 = vmatmul.mubr.f32.vlgmr.msra.gmra.mrb[2].mxu0 %v235_v2 }
 0x2a1   :  { %v474_v4 = vpop.f32.mrb[2].mxu0 }
 0x2a2   :  { %v331_v5 = vadd.f32 %v474_v4, %v357_v3  ;;  %v325_v6 = vpop.f32.mrb[3].mxu0 }
 0x2a3   :  { %v326_v7 = vadd.f32 %v357_v3, %v325_v6 }
 0x2a4   :  { %335 = vst.msk [vmem:[#allocation5 + $0x8] sm:$0xff] %vm52_vm0, %v331_v5 }
 0x2a5   :  { %334 = vst.msk [vmem:[#allocation5] sm:$0xff] %vm52_vm0, %v326_v7 }
 0x2a6   :  { %580 = shalt.err (!%p577_p12)
}
 0x2a7   :  { %s581_s19 = scalar_lea.hbm %s791_s7, 256 }
 0x2a8   :  { %p582_p13 = scmp.ne.s32.totalorder %s791_s7, %s581_s19  ;;  %p585_p0 = scmp.lt.u32.totalorder %s581_s19, %s791_s7 }
 0x2aa   :  { %p587_p1 = pnand %p585_p0, %p582_p13 }
 0x2ac   :  { %590 = shalt.err (!%p587_p1)
}
 0x2ad   :  { %347 = dma.vmem_to_hbm [thread:$0]  %s342_s17, 256, %s791_s7, [#allocation4], %s596_s11, %s596_s11, %s597_s12  }
 0x2ae   :  { %593 = dma.done.wait [#allocation4], 256  }
 0x2af   :  { %594 = vsyncadd [#allocation4], 4294967040 }
 0x2b0   :  { %351 = vsyncpa [#allocation3], 1 }
 0x2b1   :  { %352 = vsyncpa [#allocation4], 1 }

// kernel: tpu_custom_call.1
= control target key start
LH: loop header
LB: loop body
LE: loop exit
PB: predicated region body
PF: predicated region fallthrough
CT: control target
= control target key end

     0   :  { %12 = vsyncpa [#allocation3], 0  ;;  %s784_s0 = inlined_call_operand.vmem [shape: f32[16,16], index: 0, kind: input, shape index: {}]   ;;  %s785_s1 = inlined_call_operand.hbm [shape: f32[16,128], index: 1, kind: input, shape index: {}]   ;;  %s786_s2 = inlined_call_operand.vmem [shape: f32[1,128], index: 2, kind: input, shape index: {}]   ;;  %s787_s3 = inlined_call_operand.vmem [shape: f32[128,128], index: 3, kind: input, shape index: {}]   ;;  %s788_s4 = inlined_call_operand.vmem [shape: f32[1,128], index: 4, kind: input, shape index: {}]   ;;  %s789_s5 = inlined_call_operand.vmem [shape: f32[128,16], index: 5, kind: input, shape index: {}]   ;;  %s790_s6 = inlined_call_operand.vmem [shape: f32[1,16], index: 6, kind: input, shape index: {}]   ;;  %s791_s7 = inlined_call_operand.hbm [shape: f32[16,16], index: 7, kind: output, shape index: {}]  }
   0x1   :  { %13 = vsyncpa [#allocation4], 0  ;;  %s595_s24 = smov [#allocation2]   ;;  %s547_s28 = scalar_lea.hbm %s785_s1, 256 }
   0x2   :  { %s21_s25 = sshll.u32 %s595_s24, 4  ;;  %p548_p0 = scmp.ne.s32.totalorder %s785_s1, %s547_s28  ;;  %s22_s25 = int_to_ptr.vmem [resolvable:$true] %s21_s25 }
   0x3   :  { %p551_p1 = scmp.lt.u32.totalorder %s547_s28, %s785_s1 }
   0x5   :  { %p553_p2 = pnand %p551_p1, %p548_p0 }
   0x7   :  { %556 = shalt.err (!%p553_p2)
}
   0x8   :  { %s557_s10 = scalar_lea.vmem %s22_s25, 256  ;;  %p562_p4 = scmp.lt.s32.totalorder %s22_s25, %s22_s25 }
   0x9   :  { %p558_p3 = scmp.ne.s32.totalorder %s22_s25, %s557_s10  ;;  %p563_p5 = scmp.lt.s32.totalorder %s557_s10, %s557_s10 }
   0xb   :  { %p564_p6 = por %p563_p5, %p562_p4 }
   0xd   :  { %p565_p7 = pnand %p564_p6, %p558_p3 }
   0xf   :  { %568 = shalt.err (!%p565_p7)
}
  0x10   :  { %s596_s11 = smov 128   ;;  %s597_s12 = smov 8  }
  0x11   :  { %27 = dma.hbm_to_vmem [thread:$0]  %s785_s1, 256, %s22_s25, [#allocation3], %s596_s11, %s596_s11, %s597_s12  }
  0x12   :  { %591 = dma.done.wait [#allocation3], 256  }
  0x13   :  { %592 = vsyncadd [#allocation3], 4294967040  ;;  %vm52_vm0 = vcmask 130048   ;;  %v43_v0 = vld [vmem:[#allocation2] sm:$0xff]  ;;  %v44_v1 = vld [vmem:[#allocation2 + $0x8] sm:$0xff] }
  0x14   :  { %v41_v2 = vld [vmem:[%s784_s0] sm:$0xff]  ;;  %v475_v3 = vpack.c.bf16 %v44_v1, %v43_v0  ;;  %v137_v5 = vld [vmem:[%s787_s3 + $0x8] sm:$0xff]  ;;  %v138_v7 = vld [vmem:[%s787_s3 + $0x10] sm:$0xff] }
  0x15   :  { %402 = vmatprep.mubr.msk.f32.mxu0 %vm52_vm0, %v41_v2  ;;  %v136_v4 = vld [vmem:[%s787_s3] sm:$0xff]  ;;  %v139_v8 = vld [vmem:[%s787_s3 + $0x18] sm:$0xff]  ;;  %v141_v11 = vld [vmem:[%s787_s3 + $0x28] sm:$0xff] }
  0x16   :  { %v479_v6 = vpack.c.bf16 %v137_v5, %v136_v4  ;;  %476 = vmatprep.subr.bf16.mxu0 %v475_v3  ;;  %v483_v9 = vpack.c.bf16 %v139_v8, %v138_v7  ;;  %v140_v10 = vld [vmem:[%s787_s3 + $0x20] sm:$0xff]  ;;  %v42_v12 = vld [vmem:[%s784_s0 + $0x8] sm:$0xff]  ;;  %v142_v14 = vld [vmem:[%s787_s3 + $0x30] sm:$0xff] }
  0x17   :  { %478 = vmatpush3.bf16.msra.mxu0 %v475_v3  ;;  %v487_v13 = vpack.c.bf16 %v141_v11, %v140_v10  ;;  %v143_v15 = vld [vmem:[%s787_s3 + $0x38] sm:$0xff]  ;;  %v144_v17 = vld [vmem:[%s787_s3 + $0x40] sm:$0xff]  ;;  %v145_v18 = vld [vmem:[%s787_s3 + $0x48] sm:$0xff] }
  0x18   :  { %480 = vmatprep.subr.bf16.mxu1 %v479_v6  ;;  %v491_v16 = vpack.c.bf16 %v143_v15, %v142_v14  ;;  %v495_v19 = vpack.c.bf16 %v145_v18, %v144_v17  ;;  %v146_v20 = vld [vmem:[%s787_s3 + $0x50] sm:$0xff]  ;;  %v147_v21 = vld [vmem:[%s787_s3 + $0x58] sm:$0xff]  ;;  %v148_v23 = vld [vmem:[%s787_s3 + $0x60] sm:$0xff] }
  0x19   :  { %482 = vmatpush3.bf16.msra.mxu1 %v479_v6  ;;  %v499_v22 = vpack.c.bf16 %v147_v21, %v146_v20  ;;  %v149_v24 = vld [vmem:[%s787_s3 + $0x68] sm:$0xff]  ;;  %v150_v26 = vld [vmem:[%s787_s3 + $0x70] sm:$0xff]  ;;  %v151_v27 = vld [vmem:[%s787_s3 + $0x78] sm:$0xff] }
  0x1a   :  { %484 = vmatprep.subr.bf16.mxu1 %v483_v9  ;;  %403 = vmatmul.mubr.msk.f32.vlgmr.msra.gmra.mrb[0].mxu0 %vm52_vm0, %v42_v12  ;;  %v503_v25 = vpack.c.bf16 %v149_v24, %v148_v23  ;;  %v507_v28 = vpack.c.bf16 %v151_v27, %v150_v26  ;;  %v236_v29 = vld [vmem:[%s789_s5] sm:$0xff]  ;;  %v237_v30 = vld [vmem:[%s789_s5 + $0x8] sm:$0xff]  ;;  %v238_v31 = vld [vmem:[%s789_s5 + $0x10] sm:$0xff] }
  0x1b   :  { %v511_v32 = vpack.c.bf16 %v237_v30, %v236_v29  ;;  %v239_v33 = vld [vmem:[%s789_s5 + $0x18] sm:$0xff]  ;;  %v240_v35 = vld [vmem:[%s789_s5 + $0x20] sm:$0xff]  ;;  %v241_v36 = vld [vmem:[%s789_s5 + $0x28] sm:$0xff] }
  0x1c   :  { %v515_v34 = vpack.c.bf16 %v239_v33, %v238_v31  ;;  %v519_v37 = vpack.c.bf16 %v241_v36, %v240_v35  ;;  %v242_v38 = vld [vmem:[%s789_s5 + $0x30] sm:$0xff]  ;;  %v243_v39 = vld [vmem:[%s789_s5 + $0x38] sm:$0xff]  ;;  %v244_v41 = vld [vmem:[%s789_s5 + $0x40] sm:$0xff] }
  0x1d   :  { %486 = vmatpush3.bf16.msra.mxu1 %v483_v9  ;;  %512 = vmatprep.subr.bf16.mxu0 %v511_v32  ;;  %v523_v40 = vpack.c.bf16 %v243_v39, %v242_v38  ;;  %v245_v42 = vld [vmem:[%s789_s5 + $0x48] sm:$0xff]  ;;  %v246_v44 = vld [vmem:[%s789_s5 + $0x50] sm:$0xff]  ;;  %v247_v45 = vld [vmem:[%s789_s5 + $0x58] sm:$0xff] }
  0x1e   :  { %488 = vmatprep.subr.bf16.mxu1 %v487_v13  ;;  %514 = vmatpush3.bf16.msra.mxu0 %v511_v32  ;;  %v527_v43 = vpack.c.bf16 %v245_v42, %v244_v41  ;;  %v531_v46 = vpack.c.bf16 %v247_v45, %v246_v44  ;;  %v248_v47 = vld [vmem:[%s789_s5 + $0x60] sm:$0xff]  ;;  %v249_v48 = vld [vmem:[%s789_s5 + $0x68] sm:$0xff]  ;;  %v250_v57 = vld [vmem:[%s789_s5 + $0x70] sm:$0xff] }
  0x1f   :  { %516 = vmatprep.subr.bf16.mxu0 %v515_v34  ;;  %v535_v49 = vpack.c.bf16 %v249_v48, %v248_v47  ;;  %v353_v50 = vld [vmem:[%s786_s2] ss:$0 sm:$0xff]  ;;  %v251_v58 = vld [vmem:[%s789_s5 + $0x78] sm:$0xff]  ;;  %s598_s5 = smov [#allocation5]  }
  0x20   :  { %v539_v59 = vpack.c.bf16 %v251_v58, %v250_v57  ;;  %v356_v60 = vld [vmem:[%s788_s4] ss:$0 sm:$0xff]  ;;  %s341_s17 = sshll.u32 %s598_s5, 4  ;;  %s342_s17 = int_to_ptr.vmem [resolvable:$true] %s341_s17 }
  0x21   :  { %490 = vmatpush3.bf16.msra.mxu1 %v487_v13  ;;  %v357_v3 = vld [vmem:[%s790_s6] ss:$0 sm:$0xff]  ;;  %s569_s4 = scalar_lea.vmem %s342_s17, 256  ;;  %p574_p9 = scmp.lt.s32.totalorder %s342_s17, %s342_s17 }
  0x22   :  { %492 = vmatprep.subr.bf16.mxu1 %v491_v16  ;;  %518 = vmatpush3.bf16.msra.mxu0 %v515_v34  ;;  %p570_p8 = scmp.ne.s32.totalorder %s342_s17, %s569_s4  ;;  %p575_p10 = scmp.lt.s32.totalorder %s569_s4, %s569_s4 }
  0x23   :  { %520 = vmatprep.subr.bf16.mxu0 %v519_v37 }
  0x24   :  { %p576_p11 = por %p575_p10, %p574_p9 }
  0x25   :  { %494 = vmatpush3.bf16.msra.mxu1 %v491_v16 }
  0x26   :  { %496 = vmatprep.subr.bf16.mxu1 %v495_v19  ;;  %522 = vmatpush3.bf16.msra.mxu0 %v519_v37  ;;  %p577_p12 = pnand %p576_p11, %p570_p8 }
  0x27   :  { %524 = vmatprep.subr.bf16.mxu0 %v523_v40 }
  0x29   :  { %498 = vmatpush3.bf16.msra.mxu1 %v495_v19 }
  0x2a   :  { %500 = vmatprep.subr.bf16.mxu1 %v499_v22  ;;  %526 = vmatpush3.bf16.msra.mxu0 %v523_v40 }
  0x2b   :  { %528 = vmatprep.subr.bf16.mxu0 %v527_v43 }
  0x2d   :  { %502 = vmatpush3.bf16.msra.mxu1 %v499_v22 }
  0x2e   :  { %504 = vmatprep.subr.bf16.mxu1 %v503_v25  ;;  %530 = vmatpush3.bf16.msra.mxu0 %v527_v43 }
  0x2f   :  { %532 = vmatprep.subr.bf16.mxu0 %v531_v46 }
  0x31   :  { %506 = vmatpush3.bf16.msra.mxu1 %v503_v25 }
  0x32   :  { %508 = vmatprep.subr.bf16.mxu1 %v507_v28  ;;  %534 = vmatpush3.bf16.msra.mxu0 %v531_v46 }
  0x33   :  { %536 = vmatprep.subr.bf16.mxu0 %v535_v49 }
  0x35   :  { %510 = vmatpush3.bf16.msra.mxu1 %v507_v28 }
  0x36   :  { %538 = vmatpush3.bf16.msra.mxu0 %v535_v49 }
  0x37   :  { %540 = vmatprep.subr.bf16.mxu0 %v539_v59 }
  0x3a   :  { %542 = vmatpush3.bf16.msra.mxu0 %v539_v59 }
  0xed   :  { %v404_v51 = vpop.f32.mrb[0].mxu0 }
  0xee   :  { %v131_v52 = vadd.f32 %v404_v51, %v353_v50  ;;  %v125_v53 = vpop.f32.mrb[1].mxu0 }
  0xef   :  { %v126_v54 = vadd.f32 %v353_v50, %v125_v53 }
  0xf0   :  { %v135_v56 = vmax.f32 %v131_v52, 0.0 }
  0xf1   :  { %v134_v55 = vmax.f32 %v126_v54, 0.0 }
  0xf3   :  { %437 = vmatprep.mubr.f32.mxu1 %v134_v55 }
  0xf4   :  { %438 = vmatmul.mubr.f32.vlgmr.msra.gmra.mrb[0].mxu1 %v135_v56 }
 0x1c7   :  { %v439_v61 = vpop.f32.mrb[0].mxu1 }
 0x1c8   :  { %v231_v62 = vadd.f32 %v439_v61, %v356_v60  ;;  %v225_v63 = vpop.f32.mrb[1].mxu1 }
 0x1c9   :  { %v226_v0 = vadd.f32 %v356_v60, %v225_v63 }
 0x1ca   :  { %v235_v2 = vmax.f32 %v231_v62, 0.0 }
 0x1cb   :  { %v234_v1 = vmax.f32 %v226_v0, 0.0 }
 0x1cd   :  { %472 = vmatprep.mubr.f32.mxu0 %v234_v1 }
 0x1ce   :  { %473 = vmatmul.mubr.f32.vlgmr.msra.gmra.mrb[2].mxu0 %v235_v2 }
 0x2a1   :  { %v474_v4 = vpop.f32.mrb[2].mxu0 }
 0x2a2   :  { %v331_v5 = vadd.f32 %v474_v4, %v357_v3  ;;  %v325_v6 = vpop.f32.mrb[3].mxu0 }
 0x2a3   :  { %v326_v7 = vadd.f32 %v357_v3, %v325_v6 }
 0x2a4   :  { %335 = vst.msk [vmem:[#allocation5 + $0x8] sm:$0xff] %vm52_vm0, %v331_v5 }
 0x2a5   :  { %334 = vst.msk [vmem:[#allocation5] sm:$0xff] %vm52_vm0, %v326_v7 }
 0x2a6   :  { %580 = shalt.err (!%p577_p12)
}
 0x2a7   :  { %s581_s19 = scalar_lea.hbm %s791_s7, 256 }
 0x2a8   :  { %p582_p13 = scmp.ne.s32.totalorder %s791_s7, %s581_s19  ;;  %p585_p0 = scmp.lt.u32.totalorder %s581_s19, %s791_s7 }
 0x2aa   :  { %p587_p1 = pnand %p585_p0, %p582_p13 }
 0x2ac   :  { %590 = shalt.err (!%p587_p1)
}
 0x2ad   :  { %347 = dma.vmem_to_hbm [thread:$0]  %s342_s17, 256, %s791_s7, [#allocation4], %s596_s11, %s596_s11, %s597_s12  }
 0x2ae   :  { %593 = dma.done.wait [#allocation4], 256  }
 0x2af   :  { %594 = vsyncadd [#allocation4], 4294967040 }
 0x2b0   :  { %351 = vsyncpa [#allocation3], 1 }
 0x2b1   :  { %352 = vsyncpa [#allocation4], 1 }

</bundles_post_ra>
